<compile_context>
chip_gen: v7x
topology: tpu7x:2x2x1
jax: 0.10.0
libtpu: 0.0.40
codegen_flags: <defaults>
</compile_context>

<pallas_src>
import functools

import jax
import jax.numpy as jnp
from jax import lax
from jax.experimental import pallas as pl
from jax.experimental.pallas import tpu as pltpu

LANE = 128


def _focal_sums_kernel(w_ref, x_ref, t_ref, out_ref, *, num_classes, gamma,
                       ignore_index, label_smoothing, use_weight, sub_rows,
                       n_sub):
    """Accumulates sum(per-pixel focal loss) and count(valid pixels).

    w_ref:   (C,) float32 class weights in SMEM (ones when weight is None)
    x_ref:   (1, C, TILE_ROWS, 128) logits block
    t_ref:   (1, 1, TILE_ROWS, 128) int32 labels block
    out_ref: (1, 2, SUB, 128) float32 accumulator resident across the pixel
             grid axis; [0] = partial focal-loss sums, [1] = valid-pixel counts.
    """
    j = pl.program_id(2)

    @pl.when(j == 0)
    def _():
        out_ref[...] = jnp.zeros_like(out_ref)

    C = num_classes
    gamma_int = int(gamma) if float(gamma) == float(int(gamma)) else None
    ws = [w_ref[c] for c in range(C)] if use_weight else None
    if label_smoothing > 0.0:
        w_total = sum(ws) if use_weight else float(C)

    def body(r, carry):
        acc_loss, acc_cnt = carry
        rows = pl.ds(pl.multiple_of(r * sub_rows, sub_rows), sub_rows)

        t = t_ref[0, 0, rows, :]                               # (SUB, 128) int32
        xs = [x_ref[0, c, rows, :].astype(jnp.float32) for c in range(C)]

        # class-axis max, unrolled into elementwise ops on dense tiles
        m = xs[0]
        for c in range(1, C):
            m = jnp.maximum(m, xs[c])

        s = jnp.zeros_like(m)        # sum_c exp(x_c - m)
        x_y = jnp.zeros_like(m)      # logit of the target class
        e_y = jnp.zeros_like(m)      # exp(x_y - m), reused from the loop
        w_y = jnp.zeros_like(m) if use_weight else None
        wx_sum = jnp.zeros_like(m) if label_smoothing > 0.0 else None

        for c in range(C):
            xc = xs[c]
            ec = jnp.exp(xc - m)
            s = s + ec
            hit = t == c
            x_y = jnp.where(hit, xc, x_y)
            e_y = jnp.where(hit, ec, e_y)
            if use_weight:
                w_y = jnp.where(hit, ws[c], w_y)
            if label_smoothing > 0.0:
                wx_sum = wx_sum + (ws[c] * xc if use_weight else xc)

        log_s = jnp.log(s)
        neg_logp_y = log_s + (m - x_y)                  # -log softmax(x)[y]
        p_y = e_y * pl.reciprocal(s, approx=True)       # softmax(x)[y] via EUP

        ce = w_y * neg_logp_y if use_weight else neg_logp_y
        if label_smoothing > 0.0:
            smooth = w_total * (m + log_s) - wx_sum     # sum_c w_c * (-log p_c)
            ce = (1.0 - label_smoothing) * ce + (label_smoothing / C) * smooth

        one_minus_p = 1.0 - p_y
        fw = (one_minus_p ** gamma_int if gamma_int is not None
              else jnp.power(one_minus_p, jnp.float32(gamma)))

        valid = (t != ignore_index).astype(jnp.float32)
        return acc_loss + fw * ce * valid, acc_cnt + valid

    zero = jnp.zeros((sub_rows, LANE), jnp.float32)
    acc_loss, acc_cnt = lax.fori_loop(0, n_sub, body, (zero, zero))

    out_ref[0, 0] += acc_loss
    out_ref[0, 1] += acc_cnt


def focal_loss(pred, target, *, weight=None, gamma=2, ignore_index=-1,
               reduction="none", focal_reduction="mean", label_smoothing=0.0,
               normalize=False, tile_px=65536):
    """JAX/Pallas equivalent of FocalLoss.forward.

    pred:   (B, C, H, W) float logits
    target: (B, 1, H, W) (or (B, H, W)) integer labels
    """
    if reduction != "none":
        # TODO(synk): inner CrossEntropyLoss reduction != 'none' (scalar CE
        # broadcast against the per-pixel focal modulation) is not implemented.
        raise NotImplementedError("only the default reduction='none' is supported")

    B, C, H, W = pred.shape
    HW = H * W
    assert target.size == B * HW, "target must provide one label per pixel"

    x = pred.reshape(B, C, HW)                       # free reshape, no transpose
    t = target.reshape(B, 1, HW).astype(jnp.int32)

    # --- tiling: pixels -> (rows, 128) lanes; classes on a leading block dim ---
    rows_needed = pl.cdiv(HW, LANE)
    tile_rows = max(8, tile_px // LANE)
    # keep the double-buffered logits block well inside scoped VMEM (also v7x)
    itemsize = jnp.dtype(pred.dtype).itemsize
    while tile_rows > 8 and C * tile_rows * LANE * itemsize > 2 * 1024 * 1024:
        tile_rows //= 2
    if rows_needed <= tile_rows:
        tile_rows = rows_needed
        n_chunks = 1
    else:
        # extra parallel pixel-chunk axis keeps v7x's two TensorCores busy for
        # batch-1 inputs; batch itself is already a parallel grid axis.
        n_chunks = 2 if B == 1 else 1
    chunk_rows = tile_rows * n_chunks
    rows_pad = pl.cdiv(rows_needed, chunk_rows) * chunk_rows
    n_tiles = rows_pad // chunk_rows
    hw_pad = rows_pad * LANE

    if hw_pad != HW:
        # padded pixels carry ignore_index -> masked inside the kernel
        x = jnp.pad(x, ((0, 0), (0, 0), (0, hw_pad - HW)))
        t = jnp.pad(t, ((0, 0), (0, 0), (0, hw_pad - HW)),
                    constant_values=ignore_index)
    x = x.reshape(B, C, rows_pad, LANE)
    t = t.reshape(B, 1, rows_pad, LANE)

    use_weight = weight is not None
    w_vec = (jnp.asarray(weight, jnp.float32).reshape(C) if use_weight
             else jnp.ones((C,), jnp.float32))

    # in-kernel compute chunk (vreg-sized) to keep register pressure low
    if tile_rows % 16 == 0:
        sub_rows = 16
    elif tile_rows % 8 == 0:
        sub_rows = 8
    else:
        sub_rows = tile_rows
    n_sub = tile_rows // sub_rows

    kernel = functools.partial(
        _focal_sums_kernel, num_classes=C, gamma=gamma,
        ignore_index=ignore_index, label_smoothing=float(label_smoothing),
        use_weight=use_weight, sub_rows=sub_rows, n_sub=n_sub)

    out = pl.pallas_call(
        kernel,
        out_shape=jax.ShapeDtypeStruct((B * n_chunks, 2, sub_rows, LANE),
                                       jnp.float32),
        grid_spec=pltpu.PrefetchScalarGridSpec(
            num_scalar_prefetch=0,
            grid=(B, n_chunks, n_tiles),
            in_specs=[
                pl.BlockSpec(memory_space=pltpu.MemorySpace.SMEM),
                pl.BlockSpec((1, C, tile_rows, LANE),
                             lambda b, c, j: (b, 0, c * n_tiles + j, 0)),
                pl.BlockSpec((1, 1, tile_rows, LANE),
                             lambda b, c, j: (b, 0, c * n_tiles + j, 0)),
            ],
            out_specs=pl.BlockSpec((1, 2, sub_rows, LANE),
                                   lambda b, c, j: (b * n_chunks + c, 0, 0, 0)),
        ),
        compiler_params=pltpu.CompilerParams(
            dimension_semantics=("parallel", "parallel", "arbitrary")),
    )(w_vec, x, t)

    loss_sum = jnp.sum(out[:, 0])
    valid_cnt = jnp.sum(out[:, 1])

    if normalize:
        # losses /= losses.sum() before the focal reduction
        if focal_reduction == "mean":
            return (loss_sum / loss_sum) / valid_cnt
        if focal_reduction == "sum":
            return loss_sum / loss_sum
    else:
        if focal_reduction == "mean":
            return loss_sum / valid_cnt
        if focal_reduction == "sum":
            return loss_sum
    raise ValueError("Invalid focal_reduction")


def _focal_loss_ref(pred, target, weight, gamma, ignore_index):
    """Pure-JAX reference mirroring the PyTorch FocalLoss.forward."""
    B, C, H, W = pred.shape
    x = jnp.transpose(pred, (0, 2, 3, 1)).reshape(-1, C).astype(jnp.float32)
    t = target.reshape(-1)
    valid = t != ignore_index
    t_safe = jnp.where(valid, t, 0)
    logp = jax.nn.log_softmax(x, axis=-1)
    logp_y = jnp.take_along_axis(logp, t_safe[:, None], axis=-1)[:, 0]
    p_y = jnp.exp(logp_y)
    w_y = weight[t_safe] if weight is not None else jnp.float32(1.0)
    ce = -w_y * logp_y
    losses = (1.0 - p_y) ** gamma * ce
    losses = jnp.where(valid, losses, 0.0)
    return jnp.sum(losses) / jnp.sum(valid.astype(jnp.float32))


if __name__ == "__main__":
    B, C, H, W = 2, 4, 16, 16

    key = jax.random.PRNGKey(0)
    k_pred, k_tgt = jax.random.split(key)
    pred = jax.random.normal(k_pred, (B, C, H, W), dtype=jnp.float32)
    target = jax.random.randint(k_tgt, (B, 1, H, W), 0, C, dtype=jnp.int32)
    # mark a few pixels as ignored (ignore_index = -1)
    target = target.at[0, 0, 0, :5].set(-1)

    # deterministic per-class weights (module __init__ takes `weight`)
    weight = (jnp.arange(C, dtype=jnp.float32) + 1.0) / C

    loss = focal_loss(pred, target, weight=weight, gamma=2, ignore_index=-1,
                      reduction="none", focal_reduction="mean",
                      label_smoothing=0.0, normalize=False)
    jax.block_until_ready(loss)

    ref = _focal_loss_ref(pred, target, weight, 2, -1)
    assert bool(jnp.isfinite(loss)), float(loss)
    assert abs(float(loss) - float(ref)) <= 1e-2 * max(1.0, abs(float(ref))), (
        float(loss), float(ref))
    print("KERNEL_OK")
</pallas_src>

<mosaic_0001>
module attributes {stable_mosaic.version = 11 : i64} {
  func.func @_focal_sums_kernel(%arg0: i32, %arg1: i32, %arg2: i32, %arg3: memref<4xf32, #tpu.memory_space<smem>>, %arg4: memref<1x4x2x128xf32, #tpu.memory_space<vmem>>, %arg5: memref<1x1x2x128xi32, #tpu.memory_space<vmem>>, %arg6: memref<1x2x2x128xf32, #tpu.memory_space<vmem>>) attributes {dimension_semantics = [#tpu.dimension_semantics<parallel>, #tpu.dimension_semantics<parallel>, #tpu.dimension_semantics<arbitrary>], iteration_bounds = array<i64: 2, 1, 1>, scalar_prefetch = 0 : i64, scratch_operands = 0 : i64, tpu.core_type = #tpu.core_type<tc>, window_params = [{transform_indices = @transform_0, window_bounds = array<i64: 4>}, {transform_indices = @transform_1, window_bounds = array<i64: 1, 4, 2, 128>}, {transform_indices = @transform_2, window_bounds = array<i64: 1, 1, 2, 128>}, {transform_indices = @transform_3, window_bounds = array<i64: 1, 2, 2, 128>}]} {
    %c0_i32 = arith.constant 0 : i32
    %0 = arith.cmpi eq, %arg2, %c0_i32 : i32
    %1 = arith.extui %0 : i1 to i32
    %c0_i32_0 = arith.constant 0 : i32
    %2 = arith.cmpi ne, %1, %c0_i32_0 : i32
    scf.if %2 {
      %cst_41 = arith.constant 0.000000e+00 : f32
      %97 = vector.broadcast %cst_41 : f32 to vector<1x2x2x128xf32>
      %c0_42 = arith.constant 0 : index
      %c0_43 = arith.constant 0 : index
      %c0_44 = arith.constant 0 : index
      %c0_45 = arith.constant 0 : index
      %98 = vector.load %arg6[%c0_42, %c0_43, %c0_44, %c0_45] : memref<1x2x2x128xf32, #tpu.memory_space<vmem>>, vector<1x2x2x128xf32>
      tpu.vector_store %arg6[%c0_42, %c0_43, %c0_44, %c0_45], %97 {strides = array<i32>} : memref<1x2x2x128xf32, #tpu.memory_space<vmem>>, vector<1x2x2x128xf32>,
    } else {
    }
    %c0 = arith.constant 0 : index
    %3 = memref.load %arg3[%c0] : memref<4xf32, #tpu.memory_space<smem>>
    %c1 = arith.constant 1 : index
    %4 = memref.load %arg3[%c1] : memref<4xf32, #tpu.memory_space<smem>>
    %c2 = arith.constant 2 : index
    %5 = memref.load %arg3[%c2] : memref<4xf32, #tpu.memory_space<smem>>
    %c3 = arith.constant 3 : index
    %6 = memref.load %arg3[%c3] : memref<4xf32, #tpu.memory_space<smem>>
    %cst = arith.constant 0.000000e+00 : f32
    %7 = vector.broadcast %cst : f32 to vector<2x128xf32>
    %c0_i32_1 = arith.constant 0 : i32
    %c2_i32 = arith.constant 2 : i32
    %8 = arith.muli %c0_i32_1, %c2_i32 : i32
    %9 = tpu.assume_multiple %8, 2 : i32
    %c0_2 = arith.constant 0 : index
    %c0_3 = arith.constant 0 : index
    %10 = arith.index_cast %9 : i32 to index
    %c0_4 = arith.constant 0 : index
    %11 = vector.load %arg5[%c0_2, %c0_3, %10, %c0_4] : memref<1x1x2x128xi32, #tpu.memory_space<vmem>>, vector<1x1x2x128xi32>
    %12 = vector.shape_cast %11 : vector<1x1x2x128xi32> to vector<2x128xi32>
    %c0_5 = arith.constant 0 : index
    %c0_6 = arith.constant 0 : index
    %13 = arith.index_cast %9 : i32 to index
    %c0_7 = arith.constant 0 : index
    %14 = vector.load %arg4[%c0_5, %c0_6, %13, %c0_7] : memref<1x4x2x128xf32, #tpu.memory_space<vmem>>, vector<1x1x2x128xf32>
    %15 = vector.shape_cast %14 : vector<1x1x2x128xf32> to vector<2x128xf32>
    %c0_8 = arith.constant 0 : index
    %c1_9 = arith.constant 1 : index
    %16 = arith.index_cast %9 : i32 to index
    %c0_10 = arith.constant 0 : index
    %17 = vector.load %arg4[%c0_8, %c1_9, %16, %c0_10] : memref<1x4x2x128xf32, #tpu.memory_space<vmem>>, vector<1x1x2x128xf32>
    %18 = vector.shape_cast %17 : vector<1x1x2x128xf32> to vector<2x128xf32>
    %c0_11 = arith.constant 0 : index
    %c2_12 = arith.constant 2 : index
    %19 = arith.index_cast %9 : i32 to index
    %c0_13 = arith.constant 0 : index
    %20 = vector.load %arg4[%c0_11, %c2_12, %19, %c0_13] : memref<1x4x2x128xf32, #tpu.memory_space<vmem>>, vector<1x1x2x128xf32>
    %21 = vector.shape_cast %20 : vector<1x1x2x128xf32> to vector<2x128xf32>
    %c0_14 = arith.constant 0 : index
    %c3_15 = arith.constant 3 : index
    %22 = arith.index_cast %9 : i32 to index
    %c0_16 = arith.constant 0 : index
    %23 = vector.load %arg4[%c0_14, %c3_15, %22, %c0_16] : memref<1x4x2x128xf32, #tpu.memory_space<vmem>>, vector<1x1x2x128xf32>
    %24 = vector.shape_cast %23 : vector<1x1x2x128xf32> to vector<2x128xf32>
    %25 = arith.maximumf %15, %18 : vector<2x128xf32>
    %26 = arith.maximumf %25, %21 : vector<2x128xf32>
    %27 = arith.maximumf %26, %24 : vector<2x128xf32>
    %cst_17 = arith.constant 0.000000e+00 : f32
    %28 = vector.broadcast %cst_17 : f32 to vector<2x128xf32>
    %cst_18 = arith.constant 0.000000e+00 : f32
    %29 = vector.broadcast %cst_18 : f32 to vector<2x128xf32>
    %cst_19 = arith.constant 0.000000e+00 : f32
    %30 = vector.broadcast %cst_19 : f32 to vector<2x128xf32>
    %cst_20 = arith.constant 0.000000e+00 : f32
    %31 = vector.broadcast %cst_20 : f32 to vector<2x128xf32>
    %32 = arith.subf %15, %27 : vector<2x128xf32>
    %33 = math.exp %32 : vector<2x128xf32>
    %34 = arith.addf %28, %33 : vector<2x128xf32>
    %c0_i32_21 = arith.constant 0 : i32
    %35 = vector.broadcast %c0_i32_21 : i32 to vector<2x128xi32>
    %36 = arith.cmpi eq, %12, %35 : vector<2x128xi32>
    %37 = arith.select %36, %15, %29 : vector<2x128xi1>, vector<2x128xf32>
    %38 = arith.select %36, %33, %30 : vector<2x128xi1>, vector<2x128xf32>
    %39 = vector.broadcast %3 : f32 to vector<2x128xf32>
    %40 = arith.select %36, %39, %31 : vector<2x128xi1>, vector<2x128xf32>
    %41 = arith.subf %18, %27 : vector<2x128xf32>
    %42 = math.exp %41 : vector<2x128xf32>
    %43 = arith.addf %34, %42 : vector<2x128xf32>
    %c1_i32 = arith.constant 1 : i32
    %44 = vector.broadcast %c1_i32 : i32 to vector<2x128xi32>
    %45 = arith.cmpi eq, %12, %44 : vector<2x128xi32>
    %46 = arith.select %45, %18, %37 : vector<2x128xi1>, vector<2x128xf32>
    %47 = arith.select %45, %42, %38 : vector<2x128xi1>, vector<2x128xf32>
    %48 = vector.broadcast %4 : f32 to vector<2x128xf32>
    %49 = arith.select %45, %48, %40 : vector<2x128xi1>, vector<2x128xf32>
    %50 = arith.subf %21, %27 : vector<2x128xf32>
    %51 = math.exp %50 : vector<2x128xf32>
    %52 = arith.addf %43, %51 : vector<2x128xf32>
    %c2_i32_22 = arith.constant 2 : i32
    %53 = vector.broadcast %c2_i32_22 : i32 to vector<2x128xi32>
    %54 = arith.cmpi eq, %12, %53 : vector<2x128xi32>
    %55 = arith.select %54, %21, %46 : vector<2x128xi1>, vector<2x128xf32>
    %56 = arith.select %54, %51, %47 : vector<2x128xi1>, vector<2x128xf32>
    %57 = vector.broadcast %5 : f32 to vector<2x128xf32>
    %58 = arith.select %54, %57, %49 : vector<2x128xi1>, vector<2x128xf32>
    %59 = arith.subf %24, %27 : vector<2x128xf32>
    %60 = math.exp %59 : vector<2x128xf32>
    %61 = arith.addf %52, %60 : vector<2x128xf32>
    %c3_i32 = arith.constant 3 : i32
    %62 = vector.broadcast %c3_i32 : i32 to vector<2x128xi32>
    %63 = arith.cmpi eq, %12, %62 : vector<2x128xi32>
    %64 = arith.select %63, %24, %55 : vector<2x128xi1>, vector<2x128xf32>
    %65 = arith.select %63, %60, %56 : vector<2x128xi1>, vector<2x128xf32>
    %66 = vector.broadcast %6 : f32 to vector<2x128xf32>
    %67 = arith.select %63, %66, %58 : vector<2x128xi1>, vector<2x128xf32>
    %68 = math.log %61 : vector<2x128xf32>
    %69 = arith.subf %27, %64 : vector<2x128xf32>
    %70 = arith.addf %68, %69 : vector<2x128xf32>
    %71 = tpu.reciprocal %61 {approx = true} : vector<2x128xf32> -> vector<2x128xf32>
    %72 = arith.mulf %65, %71 : vector<2x128xf32>
    %73 = arith.mulf %67, %70 : vector<2x128xf32>
    %cst_23 = arith.constant 1.000000e+00 : f32
    %74 = vector.broadcast %cst_23 : f32 to vector<2x128xf32>
    %75 = arith.subf %74, %72 : vector<2x128xf32>
    %76 = arith.mulf %75, %75 : vector<2x128xf32>
    %c-1_i32 = arith.constant -1 : i32
    %77 = vector.broadcast %c-1_i32 : i32 to vector<2x128xi32>
    %78 = arith.cmpi ne, %12, %77 : vector<2x128xi32>
    %79 = arith.extui %78 : vector<2x128xi1> to vector<2x128xi32>
    %80 = arith.sitofp %79 : vector<2x128xi32> to vector<2x128xf32>
    %81 = arith.mulf %76, %73 : vector<2x128xf32>
    %82 = arith.mulf %81, %80 : vector<2x128xf32>
    %83 = arith.addf %7, %82 : vector<2x128xf32>
    %84 = arith.addf %7, %80 : vector<2x128xf32>
    %c1_i32_24 = arith.constant 1 : i32
    %c0_25 = arith.constant 0 : index
    %c0_26 = arith.constant 0 : index
    %c0_27 = arith.constant 0 : index
    %c0_28 = arith.constant 0 : index
    %85 = vector.load %arg6[%c0_25, %c0_26, %c0_27, %c0_28] : memref<1x2x2x128xf32, #tpu.memory_space<vmem>>, vector<1x1x2x128xf32>
    %86 = vector.shape_cast %85 : vector<1x1x2x128xf32> to vector<2x128xf32>
    %87 = arith.addf %86, %83 : vector<2x128xf32>
    %c0_29 = arith.constant 0 : index
    %c0_30 = arith.constant 0 : index
    %c0_31 = arith.constant 0 : index
    %c0_32 = arith.constant 0 : index
    %88 = vector.load %arg6[%c0_29, %c0_30, %c0_31, %c0_32] : memref<1x2x2x128xf32, #tpu.memory_space<vmem>>, vector<1x1x2x128xf32>
    %89 = vector.shape_cast %88 : vector<1x1x2x128xf32> to vector<2x128xf32>
    %90 = vector.shape_cast %87 : vector<2x128xf32> to vector<1x1x2x128xf32>
    tpu.vector_store %arg6[%c0_29, %c0_30, %c0_31, %c0_32], %90 {strides = array<i32>} : memref<1x2x2x128xf32, #tpu.memory_space<vmem>>, vector<1x1x2x128xf32>,
    %c0_33 = arith.constant 0 : index
    %c1_34 = arith.constant 1 : index
    %c0_35 = arith.constant 0 : index
    %c0_36 = arith.constant 0 : index
    %91 = vector.load %arg6[%c0_33, %c1_34, %c0_35, %c0_36] : memref<1x2x2x128xf32, #tpu.memory_space<vmem>>, vector<1x1x2x128xf32>
    %92 = vector.shape_cast %91 : vector<1x1x2x128xf32> to vector<2x128xf32>
    %93 = arith.addf %92, %84 : vector<2x128xf32>
    %c0_37 = arith.constant 0 : index
    %c1_38 = arith.constant 1 : index
    %c0_39 = arith.constant 0 : index
    %c0_40 = arith.constant 0 : index
    %94 = vector.load %arg6[%c0_37, %c1_38, %c0_39, %c0_40] : memref<1x2x2x128xf32, #tpu.memory_space<vmem>>, vector<1x1x2x128xf32>
    %95 = vector.shape_cast %94 : vector<1x1x2x128xf32> to vector<2x128xf32>
    %96 = vector.shape_cast %93 : vector<2x128xf32> to vector<1x1x2x128xf32>
    tpu.vector_store %arg6[%c0_37, %c1_38, %c0_39, %c0_40], %96 {strides = array<i32>} : memref<1x2x2x128xf32, #tpu.memory_space<vmem>>, vector<1x1x2x128xf32>,
    return
  }
  func.func @transform_0(%arg0: i32, %arg1: i32, %arg2: i32) -> i32 {
    %c0_i32 = arith.constant 0 : i32
    %c0_i32_0 = arith.constant 0 : i32
    return %c0_i32 : i32
  }
  func.func @transform_1(%arg0: i32, %arg1: i32, %arg2: i32) -> (i32, i32, i32, i32) {
    %c1_i32 = arith.constant 1 : i32
    %0 = arith.muli %arg1, %c1_i32 : i32
    %1 = arith.addi %0, %arg2 : i32
    %c0_i32 = arith.constant 0 : i32
    %c0_i32_0 = arith.constant 0 : i32
    %c0_i32_1 = arith.constant 0 : i32
    return %arg0, %c0_i32, %1, %c0_i32_0 : i32, i32, i32, i32
  }
  func.func @transform_2(%arg0: i32, %arg1: i32, %arg2: i32) -> (i32, i32, i32, i32) {
    %c1_i32 = arith.constant 1 : i32
    %0 = arith.muli %arg1, %c1_i32 : i32
    %1 = arith.addi %0, %arg2 : i32
    %c0_i32 = arith.constant 0 : i32
    %c0_i32_0 = arith.constant 0 : i32
    %c0_i32_1 = arith.constant 0 : i32
    return %arg0, %c0_i32, %1, %c0_i32_0 : i32, i32, i32, i32
  }
  func.func @transform_3(%arg0: i32, %arg1: i32, %arg2: i32) -> (i32, i32, i32, i32) {
    %c1_i32 = arith.constant 1 : i32
    %0 = arith.muli %arg0, %c1_i32 : i32
    %1 = arith.addi %0, %arg1 : i32
    %c0_i32 = arith.constant 0 : i32
    %c0_i32_0 = arith.constant 0 : i32
    %c0_i32_1 = arith.constant 0 : i32
    %c0_i32_2 = arith.constant 0 : i32
    return %1, %c0_i32, %c0_i32_0, %c0_i32_1 : i32, i32, i32, i32
  }
}

</mosaic_0001>

<bundles_post_ra>
// kernel: tpu_custom_call.1
= control target key start
LH: loop header
LB: loop body
LE: loop exit
PB: predicated region body
PF: predicated region fallthrough
CT: control target
= control target key end

     0   :  { %8 = vsyncpa [#allocation5], 0  ;;  %s978_s0 = inlined_call_operand.hbm [shape: f32[4], index: 0, kind: input, shape index: {}]   ;;  %s979_s1 = inlined_call_operand.hbm [shape: f32[2,4,2,128], index: 1, kind: input, shape index: {}]   ;;  %s980_s2 = inlined_call_operand.vmem [shape: s32[2,1,2,128], index: 2, kind: input, shape index: {}]   ;;  %s981_s3 = inlined_call_operand.hbm [shape: f32[2,2,2,128], index: 3, kind: output, shape index: {}]  }
   0x1   :  { %9 = vsyncpa [#allocation3], 0 }
   0x2   :  { %11 = vsyncpa [#allocation3 + $0x1], 0 }
   0x3   :  { %12 = vsyncpa [#allocation4], 0 }
   0x4   :  { %14 = vsyncpa [#allocation4 + $0x1], 0  ;;  %s759_s12 = smov 0   ;;  %s761_s13 = smov 0  }
   0x5   :  { %s763_s14 = smov 0   ;;  %s765_s15 = smov 0  }
   0x6   :  { %s767_s16 = smov 0   ;;  %s769_s17 = smov 0  }
   0x7 LB: > { %s481_s18 = sadd.s32 4294967295, %s729_s17   ;;  %s482_s19 = sadd.s32 4294967294, %s729_s17   ;;  %s729_s17 = sphi %s769_s17, %s20_s17   ;;  %s725_s16 = sphi %s767_s16, %s1001_s16   ;;  %s721_s15 = sphi %s765_s15, %s1000_s15   ;;  %s717_s14 = sphi %s763_s14, %s999_s14   ;;  %s713_s13 = sphi %s761_s13, %s998_s13   ;;  %s709_s12 = sphi %s759_s12, %s997_s12  }
   0x8   : > { %s71_s20 = sadd.s32 1, %s717_s14  ;;  %p78_p0 = scmp.ne.s32.totalorder %s717_s14, %s713_s13 }
   0x9   : > { %p79_p1 = scmp.eq.s32.totalorder %s729_s17, 0  ;;  %p84_p2 = scmp.ne.s32.totalorder %s713_s13, %s709_s12 }
   0xa   : > { %p797_p3 = scmp.eq.s32.totalorder %s481_s18, 0  ;;  %p140_p4 = scmp.eq.s32.totalorder %s481_s18, 1 }
   0xb   : > { %p80_p5 = por %p79_p1, %p78_p0  ;;  %p146_p6 = scmp.eq.s32.totalorder %s482_s19, 1 }
   0xc   : > { %s986_s21 = scalar_select %p797_p3, 1, 0 }
   0xd   : > { %p803_p7 = por %p797_p3, %p84_p2  ;;  %p807_p8 = por %p140_p4, %p78_p0 }
   0xe   : > { %p811_p9 = por %p146_p6, %p84_p2  ;;  %p483_p10 = scmp.ge.s32.totalorder %s729_s17, 1 }
   0xf   : > { %s987_s22 = scalar_select %p803_p7, 1, 0 }
  0x10   : > { %s988_s23 = scalar_select %p807_p8, 1, 0 }
  0x11   : > { %s989_s24 = scalar_select %p811_p9, 1, 0 }
  0x12   : > { %p153_p11 = scmp.lt.s32.totalorder %s729_s17, 3  ;;  %p531_p1 = scmp.lt.s32.totalorder %s729_s17, 2 }
  0x13   : > { %s175_s26 = sand.u32 1, %s717_s14   ;;  %s39_s28 = sadd.s32 1, %s725_s16 }
  0x14   : > { %p818_p13 = pnand %p483_p10, %p153_p11  ;;  %p826_p0 = pnand %p531_p1, %p80_p5 }
  0x15   : > { %s486_s29 = sshll.u32 %s175_s26, 3  ;;  %p41_p4 = scmp.ge.s32.totalorder %s39_s28, 2 }
  0x16   : > { %p518_p7 = pneg %p818_p13  ;;  %s600_s5 = scalar_lea.hbm %s978_s0, 16 }
  0x17   : > { %p601_p6 = scmp.ne.s32.totalorder %s978_s0, %s600_s5  ;;  %p607_p5 = scmp.lt.u32.totalorder %s600_s5, %s978_s0 }
  0x18   : > { %p519_p2 = pnand %p518_p7, %p797_p3 }
  0x1a   : > { %p602_p10 = pneg %p519_p2 }
  0x1c   : > { %p603_p11 = pnand %p602_p10, %p601_p6 }
  0x1e   : > { %p604_p12 = pneg %p603_p11 }
  0x20   : > { %p609_p1 = pnand %p607_p5, %p604_p12 }
  0x22   : > { %612 = shalt.err (!%p609_p1)
}
  0x23   : > { %s731_s10 = smov [#allocation2]   ;;  %s1003_s28 = smov (%p41_p4, %s39_s28), 0 }
  0x24   : > { %521 = dma.hbm_to_smem (!%p519_p2), %s978_s0, 16, %s731_s10, [#allocation5]  }
  0x25   : > { %s508_s19 = sshll.u32 %s725_s16, 7  ;;  %s66_s30 = ssub.s32 %s725_s16, %s1003_s28 }
  0x26   : > { %s853_s6 = scalar_lea.hbm %s979_s1, %s508_s19  ;;  %p69_p7 = scmp.eq.s32.totalorder %s66_s30, 0 }
  0x27   : > { %s179_s7 = scalar_lea.vmem [#allocation6], %s486_s29  ;;  %s862_s10 = scalar_lea.sflag [#allocation3], %s175_s26 }
  0x28   : > { %s188_s8 = sshll.u32 %s179_s7, 4  ;;  %s613_s11 = scalar_lea.hbm %s853_s6, 128  ;;  %s855_s8 = int_to_ptr.vmem [resolvable:$true] %s188_s8 }
  0x29   : > { %s860_s9 = scalar_select %p69_p7, %s717_s14, %s71_s20  }
  0x2a   : > { %p614_p12 = scmp.ne.s32.totalorder %s853_s6, %s613_s11  ;;  %p615_p2 = pneg %p826_p0 }
  0x2b   : > { %s618_s29 = scalar_lea.hbm %s979_s1, 256  ;;  %p619_p10 = scmp.lt.u32.totalorder %s853_s6, %s979_s1 }
  0x2c   : > { %p616_p4 = pnand %p615_p2, %p614_p12  ;;  %p620_p11 = scmp.lt.u32.totalorder %s618_s29, %s613_s11 }
  0x2d   : > { %p622_p1 = scmp.lt.u32.totalorder %s613_s11, %s853_s6 }
  0x2e   : > { %p617_p6 = pneg %p616_p4  ;;  %p621_p5 = por %p620_p11, %p619_p10 }
  0x30   : > { %p623_p7 = por %p622_p1, %p621_p5 }
  0x32   : > { %p624_p9 = pnand %p623_p7, %p617_p6 }
  0x34   : > { %627 = shalt.err (!%p624_p9)
}
  0x35   : > { %s628_s20 = scalar_lea.vmem %s855_s8, 128  ;;  %s732_s26 = smov [#allocation6]  }
  0x36   : > { %p629_p12 = scmp.ne.s32.totalorder %s855_s8, %s628_s20  ;;  %s633_s5 = sshll.u32 %s732_s26, 4  ;;  %s634_s5 = int_to_ptr.vmem [resolvable:$false] %s633_s5 }
  0x37   : > { %s635_s7 = scalar_lea.vmem %s634_s5, 256  ;;  %p636_p3 = scmp.lt.s32.totalorder %s855_s8, %s634_s5 }
  0x38   : > { %p631_p4 = pnand %p629_p12, %p615_p2  ;;  %p637_p10 = scmp.lt.s32.totalorder %s635_s7, %s628_s20 }
  0x3a   : > { %p632_p8 = pneg %p631_p4  ;;  %p638_p11 = por %p637_p10, %p636_p3 }
  0x3c   : > { %p639_p5 = pnand %p638_p11, %p632_p8 }
  0x3e   : > { %642 = shalt.err (!%p639_p5)
}
  0x3f   : > { %s733_s11 = smov 32   ;;  %s734_s18 = smov 2  }
  0x40   : > { %525 = dma.hbm_to_vmem [thread:$0]  (!%p826_p0), %s853_s6, 128, %s855_s8, %s862_s10, %s733_s11, %s733_s11, %s734_s18  }
  0x41   : > { %212 = sbr.rel (%p818_p13) target bundleno = 147 (0x93), region = 32  ;;  %p992_p9 = scmp.ne.s32.totalorder (!%p818_p13), %s986_s21, 0 }
  0x48   : > { %696 = dma.done.wait (%p992_p9), [#allocation5], 16  }
  0x49   : > { %698 = vsyncadd (%p992_p9), [#allocation5], 4294967280  ;;  %s897_s19 = sand.u32 1, %s713_s13   ;;  %p993_p3 = scmp.ne.s32.totalorder %s987_s22, 0 }
  0x4a   : > { %s491_s29 = sshll.u32 %s897_s19, 3  ;;  %s219_s30 = scalar_lea.sflag [#allocation3], %s897_s19 }
  0x4b   : > { %s222_s4 = scalar_lea.vmem [#allocation6], %s491_s29 }
  0x4c   : > { %700 = dma.done.wait (%p993_p3), %s219_s30, 128  }
  0x4d   : > { %702 = vsyncadd (%p993_p3), %s219_s30, 4294967168 }
  0x4e   : > { %227 = sfence }
  0x4f   : > { %s492_s21 = sshll.u32 %s897_s19, 2  ;;  %p256_p8 = scmp.lt.s32.totalorder %s721_s15, 1  ;;  %v276_v0 = vld [vmem:[%s222_s4] sm:$0x3]  ;;  %v497_v1 = vld [vmem:[%s222_s4 + $0x2] sm:$0x3] }
  0x50   : > { %s908_s27 = scalar_lea.vmem [#allocation7], %s492_s21  ;;  %v735_v2 = vmov 0.0   ;;  %v498_v3 = vld [vmem:[%s222_s4 + $0x4] sm:$0x3]  ;;  %v286_v4 = vmax.f32 %v276_v0, %v497_v1  ;;  %v499_v5 = vld [vmem:[%s222_s4 + $0x6] sm:$0x3] }
  0x51   : > { %s257_s25 = scalar_select %p256_p8, %s721_s15, 1  ;;  %269 = vst [vmem:[%s908_s27] sm:$0x3] %v735_v2  ;;  %270 = vst [vmem:[%s908_s27 + $0x2] sm:$0x3] %v735_v2 }
  0x52   : > { %v287_v6 = vmax.f32 %v286_v4, %v498_v3  ;;  %s271_s20 = sld [smem:[#allocation2]]  ;;  %s494_s26 = sld [smem:[#allocation2 + $0x1]] }
  0x53   : > { %s493_s22 = sshll.u32 %s257_s25, 1  ;;  %s495_s5 = sld [smem:[#allocation2 + $0x2]] }
  0x54   : > { %v288_v7 = vmax.f32 %v287_v6, %v499_v5  ;;  %s262_s10 = scalar_lea.vmem %s980_s2, %s493_s22  ;;  %s496_s7 = sld [smem:[#allocation2 + $0x3]] }
  0x55   : > { %v275_v13 = vld [vmem:[%s262_s10] sm:$0x3]  ;;  %s509_s11 = sshll.u32 %s721_s15, 6  ;;  %s363_s18 = sshll.u32 %s908_s27, 4  ;;  %s928_s18 = int_to_ptr.vmem [resolvable:$true] %s363_s18 }
  0x56   : > { %v289_v8 = vsub.f32 %v276_v0, %v288_v7  ;;  %v298_v9 = vsub.f32 %v497_v1, %v288_v7  ;;  %v307_v10 = vsub.f32 %v498_v3, %v288_v7  ;;  %v316_v15 = vsub.f32 %v499_v5, %v288_v7  ;;  %s926_s4 = scalar_lea.hbm %s981_s3, %s509_s11  ;;  %s349_s21 = scalar_lea.sflag [#allocation4], %s897_s19 }
  0x57   : > { %vm334_vm0 = vcmp.ne.s32.totalorder %v275_v13, 4294967295  ;;  %vm293_vm1 = vcmp.eq.s32.totalorder %v275_v13, 0  ;;  %vm302_vm2 = vcmp.eq.s32.totalorder %v275_v13, 1  ;;  %vm311_vm3 = vcmp.eq.s32.totalorder %v275_v13, 2  ;;  %s643_s25 = scalar_lea.vmem %s928_s18, 64  ;;  %p994_p0 = scmp.ne.s32.totalorder %s988_s23, 0 }
  0x58   : > { %v290_v11 = vmul.f32 1.442695, %v289_v8  ;;  %v299_v12 = vmul.f32 1.442695, %v298_v9  ;;  %v308_v14 = vmul.f32 1.442695, %v307_v10  ;;  %v296_v28 = vstv %s271_s20  ;;  %p644_p13 = scmp.ne.s32.totalorder %s928_s18, %s643_s25 }
  0x59   : > { %v501_v16 = vld [vmem:[%s908_s27 + $0x2] sm:$0x3]  ;;  %v317_v17 = vmul.f32 1.442695, %v316_v15  ;;  %v500_v18 = vsel %vm334_vm0, 1.0, %v735_v2  ;;  %v294_v26 = vsel %vm293_vm1, %v276_v0, 0.0  ;;  %v305_v33 = vstv %s494_s26 }
  0x5a   : > { %588 = vpow2.f32 %v290_v11  ;;  %v346_v19 = vadd.f32 %v501_v16, %v500_v18  ;;  %v303_v30 = vsel %vm302_vm2, %v497_v1, %v294_v26  ;;  %v297_v31 = vsel %vm293_vm1, %v296_v28, 0.0  ;;  %v341_v53 = vld [vmem:[%s908_s27] sm:$0x3]  ;;  %p645_p2 = pnand %p644_p13, %p994_p0  ;;  %s736_s15 = smov [#allocation7]  }
  0x5b   : > { %590 = vpow2.f32 %v299_v12  ;;  %v312_v34 = vsel %vm311_vm3, %v498_v3, %v303_v30  ;;  %vm320_vm4 = vcmp.eq.s32.totalorder %v275_v13, 3  ;;  %v306_v35 = vsel %vm302_vm2, %v305_v33, %v297_v31  ;;  %s647_s22 = sshll.u32 %s736_s15, 4  ;;  %s648_s22 = int_to_ptr.vmem [resolvable:$false] %s647_s22 }
  0x5c   : > { %592 = vpow2.f32 %v308_v14  ;;  %502 = vst [vmem:[%s908_s27 + $0x2] sm:$0x3] %v346_v19  ;;  %v314_v37 = vstv %s495_s5  ;;  %v321_v38 = vsel %vm320_vm4, %v499_v5, %v312_v34  ;;  %v323_v41 = vstv %s496_s7  ;;  %p646_p6 = pneg %p645_p2  ;;  %s649_s6 = scalar_lea.vmem %s648_s22, 128 }
  0x5d   : > { %594 = vpow2.f32 %v317_v17  ;;  %v315_v39 = vsel %vm311_vm3, %v314_v37, %v306_v35  ;;  %v327_v42 = vsub.f32 %v288_v7, %v321_v38  ;;  %p650_p1 = scmp.lt.s32.totalorder %s928_s18, %s648_s22  ;;  %p651_p7 = scmp.lt.s32.totalorder %s649_s6, %s643_s25 }
  0x5e   : > { %v324_v46 = vsel %vm320_vm4, %v323_v41, %v315_v39 }
  0x5f   : > { %p652_p12 = por %p651_p7, %p650_p1 }
  0x61   : > { %p653_p4 = pnand %p652_p12, %p646_p6 }
  0x64   : > { %v589_v20 = vpop.eup %588 }
  0x65   : > { %v591_v21 = vpop.eup %590  ;;  %v295_v29 = vsel %vm293_vm1, %v589_v20, 0.0 }
  0x66   : > { %v593_v22 = vpop.eup %592  ;;  %v301_v23 = vadd.f32 %v591_v21, %v589_v20  ;;  %v304_v32 = vsel %vm302_vm2, %v591_v21, %v295_v29 }
  0x67   : > { %v595_v24 = vpop.eup %594  ;;  %v313_v36 = vsel %vm311_vm3, %v593_v22, %v304_v32 }
  0x68   : > { %v310_v25 = vadd.f32 %v593_v22, %v301_v23  ;;  %v322_v40 = vsel %vm320_vm4, %v595_v24, %v313_v36 }
  0x6a   : > { %v319_v27 = vadd.f32 %v595_v24, %v310_v25 }
  0x6c   : > { %596 = vlog2.f32 %v319_v27 }
  0x6d   : > { %598 = vrcp.f32 %v319_v27 }
  0x76   : > { %v597_v43 = vpop.eup %596 }
  0x77   : > { %v599_v44 = vpop.eup %598  ;;  %v326_v45 = vmul.f32 0.6931472, %v597_v43 }
  0x78   : > { %v330_v47 = vmul.f32 %v599_v44, %v322_v40 }
  0x79   : > { %v328_v48 = vadd.f32 %v327_v42, %v326_v45 }
  0x7a   : > { %v332_v49 = vsub.f32 1.0, %v330_v47 }
  0x7b   : > { %v331_v50 = vmul.f32 %v328_v48, %v324_v46 }
  0x7c   : > { %v333_v51 = vmul.f32 %v332_v49, %v332_v49 }
  0x7e   : > { %v337_v52 = vmul.f32 %v333_v51, %v331_v50 }
  0x80   : > { %v338_v54 = vmul.f32 %v500_v18, %v337_v52 }
  0x82   : > { %v342_v55 = vadd.f32 %v341_v53, %v338_v54 }
  0x84   : > { %343 = vst [vmem:[%s908_s27] sm:$0x3] %v342_v55 }
  0x85   : > { %656 = shalt.err (!%p653_p4)
}
  0x86   : > { %s657_s27 = scalar_lea.hbm %s926_s4, 64  ;;  %s661_s20 = scalar_lea.hbm %s981_s3, 128 }
  0x87   : > { %p658_p10 = scmp.ne.s32.totalorder %s926_s4, %s657_s27  ;;  %p662_p9 = scmp.lt.u32.totalorder %s926_s4, %s981_s3 }
  0x88   : > { %p663_p3 = scmp.lt.u32.totalorder %s661_s20, %s657_s27  ;;  %p665_p13 = scmp.lt.u32.totalorder %s657_s27, %s926_s4 }
  0x89   : > { %p659_p11 = pnand %p658_p10, %p994_p0 }
  0x8a   : > { %p664_p8 = por %p663_p3, %p662_p9 }
  0x8b   : > { %p660_p5 = pneg %p659_p11 }
  0x8c   : > { %p666_p2 = por %p665_p13, %p664_p8 }
  0x8e   : > { %p667_p6 = pnand %p666_p2, %p660_p5 }
  0x90   : > { %670 = shalt.err (!%p667_p6)
}
  0x91   : > { %s737_s7 = smov 32   ;;  %s738_s11 = smov 2  }
  0x92   : > { %516 = dma.vmem_to_hbm [thread:$0]  (%p994_p0), %s928_s18, 64, %s926_s4, %s349_s21, %s737_s7, %s737_s7, %s738_s11  }
  0x93 PF: > { %s378_s29 = sand.u32 1, %s709_s12   ;;  %p995_p1 = scmp.ne.s32.totalorder %s989_s24, 0 }
  0x94   : > { %p996_p7 = scmp.ge.s32.totalorder %s729_s17, 2  ;;  %s379_s30 = scalar_lea.sflag [#allocation4], %s378_s29 }
  0x96   : > { %p527_p12 = pnand %p996_p7, %p995_p1 }
  0x98   : > { %704 = dma.done.wait (!%p527_p12), %s379_s30, 64  }
  0x99   : > { %706 = vsyncadd (!%p527_p12), %s379_s30, 4294967232  ;;  %s20_s17 = sadd.s32 1, %s729_s17   ;;  %s997_s12 = smov %s713_s13 }
  0x9a   : > { %p17_p4 = scmp.ge.s32.totalorder %s20_s17, 4   ;;  %s998_s13 = smov %s717_s14 }
  0x9b   : > { %s999_s14 = smov %s860_s9  ;;  %s1000_s15 = smov %s725_s16 }
  0x9c   : > { %s1001_s16 = smov %s1003_s28  ;;  %19 = sbr.rel (!%p17_p4) target bundleno = 7 (0x7), region = 93 }
  0xa3   :  { %384 = vsyncpa [#allocation3], 1 }
  0xa4   :  { %386 = vsyncpa [#allocation3 + $0x1], 1 }
  0xa5   :  { %387 = vsyncpa [#allocation4], 1 }
  0xa6   :  { %389 = vsyncpa [#allocation4 + $0x1], 1 }
  0xa7   :  { %390 = vsyncpa [#allocation5], 1 }
  0xa8   :  { %392 = vsyncpa [#allocation5 + $0x1], 1 }

</bundles_post_ra>
